<compile_context>
chip_gen: v7x
topology: tpu7x:2x2x1
jax: 0.10.0
libtpu: 0.0.40
codegen_flags: <defaults>
</compile_context>

<pallas_src>
import functools

import jax
import jax.numpy as jnp
from jax.experimental import pallas as pl
from jax.experimental.pallas import tpu as pltpu


# ----------------------------------------------------------------------------- kernel
def _jacprop_kernel(x_ref, w_ref, b_ref, out_ref, acc_ref, *, compute_dtype):
    # x_ref:  (tm, tk)  VMEM   activations tile
    # w_ref:  (tk, tn)  VMEM   weight tile, already (In, Out) layout (usually bf16)
    # b_ref:  (1,  tn)  VMEM   bias slice
    # out_ref:(tm, tn)  VMEM   output tile
    # acc_ref:(tm, tn)  VMEM   f32 accumulator scratch (persists across K axis)
    k = pl.program_id(2)

    @pl.when(k == 0)
    def _init():
        acc_ref[...] = jnp.zeros_like(acc_ref)

    # Canonical (tm,tk) x (tk,tn) MXU matmul; casts are no-ops when the
    # operands already arrive in compute_dtype.
    acc_ref[...] += jnp.dot(
        x_ref[...].astype(compute_dtype),
        w_ref[...].astype(compute_dtype),
        preferred_element_type=jnp.float32,
    )

    @pl.when(k == pl.num_programs(2) - 1)
    def _epilogue():
        a = acc_ref[...] + b_ref[...].astype(jnp.float32)
        out_ref[...] = jnp.maximum(a, 0.0).astype(out_ref.dtype)


# ----------------------------------------------------------------------------- tiling helpers
def _vmem_capacity_bytes():
    try:
        return int(pltpu.get_tpu_info().vmem_capacity_bytes)
    except Exception:
        return 128 << 20  # conservative v5e/v6e figure


def _pick_tile(dim, target, aligns):
    """Largest tile <= target dividing `dim`, preferring the given alignments.

    Never exceeds `target` unless dim itself is <= target (a full-extent block
    is always legal under the (8,128) rule)."""
    if dim <= target:
        return dim
    for a in aligns:
        t = (target // a) * a
        while t >= a:
            if dim % t == 0:
                return t
            t -= a
    for t in range(min(target, dim), 0, -1):  # last resort: any divisor
        if dim % t == 0:
            return t
    return 1


def _vmem_estimate(tm, tn, tk, x_bytes, w_bytes, out_bytes):
    return (2 * tm * tk * x_bytes       # x tiles (double-buffered)
            + 2 * tk * tn * w_bytes     # weight tiles (double-buffered)
            + 2 * tn * 4                # bias
            + 2 * tm * tn * out_bytes   # output tiles (double-buffered)
            + tm * tn * 4)              # f32 accumulator scratch


def _can_halve(t, dim, align):
    h = t // 2
    return h >= align and h % align == 0 and dim % h == 0


def _clamp_tiles_to_vmem(tm, tn, tk, B, Out, In, x_bytes, w_bytes, out_bytes, budget):
    while _vmem_estimate(tm, tn, tk, x_bytes, w_bytes, out_bytes) > budget:
        # Shrink tk first (only adds K steps), then the larger of tm/tn.
        if _can_halve(tk, In, 128):
            tk //= 2
        elif tm >= tn and _can_halve(tm, B, 8):
            tm //= 2
        elif _can_halve(tn, Out, 128):
            tn //= 2
        elif _can_halve(tm, B, 8):
            tm //= 2
        else:
            break
    return tm, tn, tk


def _ensure_two_parallel_steps(tm, tn, B, Out):
    """v7x has 2 TensorCores: make the two 'parallel' grid axes give >= 2 steps."""
    if (B // tm) * (Out // tn) >= 2:
        return tm, tn
    if _can_halve(tn, Out, 128):
        return tm, tn // 2
    if _can_halve(tm, B, 8):
        return tm // 2, tn
    return tm, tn


# ----------------------------------------------------------------------------- wrapper
def jacprop_forward(x, w_t, bias, *, tile_m=1024, tile_n=1024, tile_k=2048,
                    use_bf16=True, out_dtype=None):
    """Forward of JacProp_layer.

    x:    (B, In)       activations (f32 or bf16; bf16 end-to-end halves DMA bytes)
    w_t:  (In, Out)     weight already transposed + (optionally) bf16 (see prepare_params)
    bias: (Out,)        f32 bias
    returns ReLU(x @ W.T + b) with shape (B, Out).
    """
    B, In = x.shape
    In2, Out = w_t.shape
    assert In == In2 and bias.shape == (Out,), (x.shape, w_t.shape, bias.shape)

    compute_dtype = jnp.bfloat16 if use_bf16 else jnp.float32
    out_dtype = x.dtype if out_dtype is None else out_dtype

    x_bytes = jnp.dtype(x.dtype).itemsize
    w_bytes = jnp.dtype(w_t.dtype).itemsize
    out_bytes = jnp.dtype(out_dtype).itemsize

    # Tile selection: MXU-native alignment preferred, never above target.
    tm = _pick_tile(B, tile_m, aligns=(256, 128, 8))
    tn = _pick_tile(Out, tile_n, aligns=(256, 128))
    tk = _pick_tile(In, tile_k, aligns=(256, 128))

    # Generation-aware VMEM budget (64 MiB v7x / 128 MiB v5e-v6e), with headroom
    # for Mosaic internal scratch.
    vmem_cap = _vmem_capacity_bytes()
    budget = int(0.70 * vmem_cap)
    tm, tn, tk = _clamp_tiles_to_vmem(tm, tn, tk, B, Out, In,
                                      x_bytes, w_bytes, out_bytes, budget)
    tm, tn = _ensure_two_parallel_steps(tm, tn, B, Out)
    assert B % tm == 0 and Out % tn == 0 and In % tk == 0, (tm, tn, tk)

    grid = (B // tm, Out // tn, In // tk)
    b2 = bias.reshape(1, Out)

    vmem_est = _vmem_estimate(tm, tn, tk, x_bytes, w_bytes, out_bytes)
    # Always pass a limit (v5e default scoped VMEM is only 16 MiB), capped at physical.
    vmem_limit = max(vmem_est + vmem_est // 2, 16 << 20)
    vmem_limit = min(vmem_limit, int(0.9 * vmem_cap))

    kernel = functools.partial(_jacprop_kernel, compute_dtype=compute_dtype)
    return pl.pallas_call(
        kernel,
        out_shape=jax.ShapeDtypeStruct((B, Out), out_dtype),
        grid=grid,
        in_specs=[
            pl.BlockSpec((tm, tk), lambda i, j, k: (i, k)),   # x tile
            pl.BlockSpec((tk, tn), lambda i, j, k: (k, j)),   # weight tile (In, Out)
            pl.BlockSpec((1, tn), lambda i, j, k: (0, j)),    # bias slice
        ],
        out_specs=pl.BlockSpec((tm, tn), lambda i, j, k: (i, j)),
        scratch_shapes=[pltpu.VMEM((tm, tn), jnp.float32)],
        compiler_params=pltpu.CompilerParams(
            dimension_semantics=("parallel", "parallel", "arbitrary"),
            vmem_limit_bytes=vmem_limit,
        ),
    )(x, w_t, b2)


# ----------------------------------------------------------------------------- params
def init_params(key, in_features, out_features):
    """kaiming_normal_ weight (fan_in, ReLU gain) + nn.Linear default bias init.

    Returns the weight in PyTorch's native (Out, In) layout, f32."""
    kw, kb = jax.random.split(key)
    std = (2.0 / in_features) ** 0.5
    weight = std * jax.random.normal(kw, (out_features, in_features), jnp.float32)
    bound = 1.0 / (in_features ** 0.5)
    bias = jax.random.uniform(kb, (out_features,), jnp.float32, -bound, bound)
    return weight, bias


def prepare_params(weight, bias, *, use_bf16=True):
    """One-time (init-time) prep: transpose W to (In, Out) and store bf16 in HBM."""
    w_t = weight.T
    if use_bf16:
        w_t = w_t.astype(jnp.bfloat16)
    return jnp.asarray(w_t), jnp.asarray(bias, jnp.float32)


# ----------------------------------------------------------------------------- demo
if __name__ == "__main__":
    key = jax.random.PRNGKey(0)
    k_x, k_p = jax.random.split(key)

    # Small demo shapes; In/Out are multiples of 128 (lane-dense loads/stores,
    # full MXU contraction depth). The megacore adjustment splits Out so the
    # parallel grid has >= 2 steps.
    B, in_features, out_features = 128, 256, 256
    x = jax.random.normal(k_x, (B, in_features), jnp.float32)
    weight, bias = init_params(k_p, in_features, out_features)
    w_t, bias = prepare_params(weight, bias, use_bf16=True)   # (In, Out) bf16

    out = jacprop_forward(x, w_t, bias)
    out = jax.block_until_ready(out)

    # References: exact bf16-operand reference (tight) and full-f32 reference (loose).
    ref_bf16 = jnp.maximum(
        jnp.dot(x.astype(jnp.bfloat16), w_t.astype(jnp.bfloat16),
                preferred_element_type=jnp.float32) + bias[None, :], 0.0)
    ref_f32 = jnp.maximum(x @ weight.T + bias[None, :], 0.0)

    assert out.shape == (B, out_features)
    assert out.dtype == x.dtype
    assert jnp.allclose(out.astype(jnp.float32), ref_bf16, atol=2e-2, rtol=2e-2)
    assert jnp.allclose(out.astype(jnp.float32), ref_f32, atol=5e-2, rtol=5e-2)

    print("KERNEL_OK")
</pallas_src>

<mosaic_0001>
module attributes {stable_mosaic.version = 11 : i64} {
  func.func @_jacprop_kernel(%arg0: i32, %arg1: i32, %arg2: i32, %arg3: memref<128x256xf32, #tpu.memory_space<vmem>>, %arg4: memref<256x128xbf16, #tpu.memory_space<vmem>>, %arg5: memref<1x128xf32, #tpu.memory_space<vmem>>, %arg6: memref<128x128xf32, #tpu.memory_space<vmem>>, %arg7: memref<128x128xf32, #tpu.memory_space<vmem>>) attributes {dimension_semantics = [#tpu.dimension_semantics<parallel>, #tpu.dimension_semantics<parallel>, #tpu.dimension_semantics<arbitrary>], iteration_bounds = array<i64: 1, 2, 1>, scalar_prefetch = 0 : i64, scratch_operands = 1 : i64, tpu.core_type = #tpu.core_type<tc>, window_params = [{transform_indices = @transform_0, window_bounds = array<i64: 128, 256>}, {transform_indices = @transform_1, window_bounds = array<i64: 256, 128>}, {transform_indices = @transform_2, window_bounds = array<i64: 1, 128>}, {transform_indices = @transform_3, window_bounds = array<i64: 128, 128>}]} {
    %c0_i32 = arith.constant 0 : i32
    %0 = arith.cmpi eq, %arg2, %c0_i32 : i32
    %1 = arith.extui %0 : i1 to i32
    %c0_i32_0 = arith.constant 0 : i32
    %2 = arith.cmpi ne, %1, %c0_i32_0 : i32
    scf.if %2 {
      %cst_10 = arith.constant 0.000000e+00 : f32
      %13 = vector.broadcast %cst_10 : f32 to vector<128x128xf32>
      %c0_11 = arith.constant 0 : index
      %c0_12 = arith.constant 0 : index
      %14 = vector.load %arg7[%c0_11, %c0_12] : memref<128x128xf32, #tpu.memory_space<vmem>>, vector<128x128xf32>
      tpu.vector_store %arg7[%c0_11, %c0_12], %13 {strides = array<i32>} : memref<128x128xf32, #tpu.memory_space<vmem>>, vector<128x128xf32>,
    } else {
    }
    %c0 = arith.constant 0 : index
    %c0_1 = arith.constant 0 : index
    %3 = vector.load %arg7[%c0, %c0_1] : memref<128x128xf32, #tpu.memory_space<vmem>>, vector<128x128xf32>
    %c0_2 = arith.constant 0 : index
    %c0_3 = arith.constant 0 : index
    %4 = vector.load %arg3[%c0_2, %c0_3] : memref<128x256xf32, #tpu.memory_space<vmem>>, vector<128x256xf32>
    %5 = arith.truncf %4 : vector<128x256xf32> to vector<128x256xbf16>
    %c0_4 = arith.constant 0 : index
    %c0_5 = arith.constant 0 : index
    %6 = vector.load %arg4[%c0_4, %c0_5] : memref<256x128xbf16, #tpu.memory_space<vmem>>, vector<256x128xbf16>
    %cst = arith.constant dense<0.000000e+00> : vector<128x128xf32>
    %7 = tpu.matmul %5, %6, %cst {dimension_numbers = #tpu.dot_dimension_numbers<[1], [0], [0], [1], [0, 0, 1, 1], [], []>} : vector<128x256xbf16>, vector<256x128xbf16>, vector<128x128xf32> -> vector<128x128xf32>
    %8 = arith.addf %3, %7 : vector<128x128xf32>
    %c0_6 = arith.constant 0 : index
    %c0_7 = arith.constant 0 : index
    %9 = vector.load %arg7[%c0_6, %c0_7] : memref<128x128xf32, #tpu.memory_space<vmem>>, vector<128x128xf32>
    tpu.vector_store %arg7[%c0_6, %c0_7], %8 {strides = array<i32>} : memref<128x128xf32, #tpu.memory_space<vmem>>, vector<128x128xf32>,
    %c0_i32_8 = arith.constant 0 : i32
    %10 = arith.cmpi eq, %arg2, %c0_i32_8 : i32
    %11 = arith.extui %10 : i1 to i32
    %c0_i32_9 = arith.constant 0 : i32
    %12 = arith.cmpi ne, %11, %c0_i32_9 : i32
    scf.if %12 {
      %c0_10 = arith.constant 0 : index
      %c0_11 = arith.constant 0 : index
      %13 = vector.load %arg7[%c0_10, %c0_11] : memref<128x128xf32, #tpu.memory_space<vmem>>, vector<128x128xf32>
      %c0_12 = arith.constant 0 : index
      %c0_13 = arith.constant 0 : index
      %14 = vector.load %arg5[%c0_12, %c0_13] : memref<1x128xf32, #tpu.memory_space<vmem>>, vector<1x128xf32>
      %15 = vector.broadcast %14 : vector<1x128xf32> to vector<128x128xf32>
      %16 = arith.addf %13, %15 : vector<128x128xf32>
      %cst_14 = arith.constant 0.000000e+00 : f32
      %17 = vector.broadcast %cst_14 : f32 to vector<128x128xf32>
      %18 = arith.maximumf %16, %17 : vector<128x128xf32>
      %c0_15 = arith.constant 0 : index
      %c0_16 = arith.constant 0 : index
      %19 = vector.load %arg6[%c0_15, %c0_16] : memref<128x128xf32, #tpu.memory_space<vmem>>, vector<128x128xf32>
      tpu.vector_store %arg6[%c0_15, %c0_16], %18 {strides = array<i32>} : memref<128x128xf32, #tpu.memory_space<vmem>>, vector<128x128xf32>,
    } else {
    }
    return
  }
  func.func @transform_0(%arg0: i32, %arg1: i32, %arg2: i32) -> (i32, i32) {
    %c0_i32 = arith.constant 0 : i32
    return %arg0, %arg2 : i32, i32
  }
  func.func @transform_1(%arg0: i32, %arg1: i32, %arg2: i32) -> (i32, i32) {
    %c0_i32 = arith.constant 0 : i32
    return %arg2, %arg1 : i32, i32
  }
  func.func @transform_2(%arg0: i32, %arg1: i32, %arg2: i32) -> (i32, i32) {
    %c0_i32 = arith.constant 0 : i32
    %c0_i32_0 = arith.constant 0 : i32
    return %c0_i32, %arg1 : i32, i32
  }
  func.func @transform_3(%arg0: i32, %arg1: i32, %arg2: i32) -> (i32, i32) {
    %c0_i32 = arith.constant 0 : i32
    return %arg0, %arg1 : i32, i32
  }
}

</mosaic_0001>

<bundles_post_ra>
// kernel: tpu_custom_call.1
= control target key start
LH: loop header
LB: loop body
LE: loop exit
PB: predicated region body
PF: predicated region fallthrough
CT: control target
= control target key end

     0   :  { %8 = vsyncpa [#allocation4], 0  ;;  %s1476_s0 = inlined_call_operand.hbm [shape: f32[128,256], index: 0, kind: input, shape index: {}]   ;;  %s1477_s1 = inlined_call_operand.hbm [shape: bf16[256,256], index: 1, kind: input, shape index: {}]   ;;  %s1478_s2 = inlined_call_operand.vmem [shape: f32[1,256], index: 2, kind: input, shape index: {}]   ;;  %s1479_s3 = inlined_call_operand.hbm [shape: f32[128,256], index: 3, kind: output, shape index: {}]  }
   0x1   :  { %9 = vsyncpa [#allocation7], 0 }
   0x2   :  { %11 = vsyncpa [#allocation7 + $0x1], 0 }
   0x3   :  { %12 = vsyncpa [#allocation5], 0 }
   0x4   :  { %14 = vsyncpa [#allocation5 + $0x1], 0  ;;  %s1192_s12 = smov 0   ;;  %s1194_s13 = smov 0  }
   0x5   :  { %s1196_s14 = smov 0   ;;  %s1198_s15 = smov 0  }
   0x6   :  { %s1200_s16 = smov 0   ;;  %s1202_s17 = smov 0  }
   0x7 LB: > { %s806_s18 = sadd.s32 4294967295, %s1159_s17   ;;  %s807_s19 = sadd.s32 4294967294, %s1159_s17   ;;  %s1159_s17 = sphi %s1202_s17, %s20_s17   ;;  %s1155_s16 = sphi %s1200_s16, %s1505_s16   ;;  %s1151_s15 = sphi %s1198_s15, %s1504_s15   ;;  %s1147_s14 = sphi %s1196_s14, %s1503_s14   ;;  %s1143_s13 = sphi %s1194_s13, %s1502_s13   ;;  %s1139_s12 = sphi %s1192_s12, %s1501_s12  }
   0x8   : > { %p83_p0 = scmp.ne.s32.totalorder %s1147_s14, %s1143_s13  ;;  %p84_p1 = scmp.eq.s32.totalorder %s1159_s17, 0 }
   0x9   : > { %p89_p2 = scmp.ne.s32.totalorder %s1143_s13, %s1139_s12  ;;  %p1229_p3 = scmp.eq.s32.totalorder %s806_s18, 0 }
   0xa   : > { %p1233_p4 = por %p84_p1, %p83_p0  ;;  %p141_p5 = scmp.eq.s32.totalorder %s806_s18, 1 }
   0xb   : > { %s1486_s20 = scalar_select %p1229_p3, 1, 0 }
   0xc   : > { %p1239_p6 = por %p1229_p3, %p89_p2  ;;  %p147_p7 = scmp.eq.s32.totalorder %s807_s19, 1 }
   0xd   : > { %p1243_p8 = por %p141_p5, %p83_p0  ;;  %p808_p9 = scmp.ge.s32.totalorder %s1159_s17, 1 }
   0xe   : > { %s1488_s22 = scalar_select %p1239_p6, 1, 0 }
   0xf   : > { %s1489_s23 = scalar_select %p1243_p8, 1, 0 }
  0x10   : > { %p1248_p10 = por %p147_p7, %p89_p2  ;;  %p154_p11 = scmp.lt.s32.totalorder %s1159_s17, 3 }
  0x11   : > { %s1161_s26 = smov [#allocation3]   ;;  %p939_p1 = scmp.lt.s32.totalorder %s1159_s17, 2 }
  0x12   : > { %s1490_s24 = scalar_select %p1248_p10, 1, 0 }
  0x13   : > { %p1253_p12 = pnand %p808_p9, %p154_p11  ;;  %s172_s27 = sshll.u32 %s1161_s26, 4  ;;  %s1257_s27 = int_to_ptr.vmem [resolvable:$true] %s172_s27 }
  0x14   : > { %p1271_p2 = pnand %p939_p1, %p1233_p4  ;;  %s35_s30 = sadd.s32 1, %s1155_s16 }
  0x15   : > { %s1491_s25 = scalar_select %p1253_p12, 1, 0 }
  0x16   : > { %p926_p13 = pneg %p1253_p12  ;;  %s1015_s6 = scalar_lea.hbm %s1476_s0, 4096 }
  0x17   : > { %s1493_s29 = scalar_select %p1271_p2, 1, 0 }
  0x18   : > { %p1265_p5 = pnand %p926_p13, %p1229_p3  ;;  %p1016_p7 = scmp.ne.s32.totalorder %s1476_s0, %s1015_s6 }
  0x19   : > { %p1022_p4 = scmp.lt.u32.totalorder %s1015_s6, %s1476_s0 }
  0x1a   : > { %p1017_p9 = pneg %p1265_p5 }
  0x1c   : > { %p1018_p11 = pnand %p1017_p9, %p1016_p7 }
  0x1e   : > { %p1019_p13 = pneg %p1018_p11 }
  0x20   : > { %p1024_p1 = pnand %p1022_p4, %p1019_p13 }
  0x22   : > { %1027 = shalt.err (!%p1024_p1)
}
  0x23   : > { %s1028_s11 = scalar_lea.vmem %s1257_s27, 4096  ;;  %p1036_p6 = scmp.lt.s32.totalorder %s1257_s27, %s1257_s27 }
  0x24   : > { %p1029_p0 = scmp.ne.s32.totalorder %s1257_s27, %s1028_s11  ;;  %p1037_p3 = scmp.lt.s32.totalorder %s1028_s11, %s1028_s11 }
  0x26   : > { %p1031_p10 = pnand %p1029_p0, %p1017_p9  ;;  %p1038_p12 = por %p1037_p3, %p1036_p6 }
  0x28   : > { %p1032_p8 = pneg %p1031_p10 }
  0x2a   : > { %p1039_p2 = pnand %p1038_p12, %p1032_p8 }
  0x2c   : > { %1042 = shalt.err (!%p1039_p2)
}
  0x2d   : > { %s1162_s18 = smov 256   ;;  %s1163_s19 = smov 16  }
  0x2e   : > { %929 = dma.hbm_to_vmem [thread:$0]  (!%p1265_p5), %s1476_s0, 4096, %s1257_s27, [#allocation4], %s1162_s18, %s1162_s18, %s1163_s19  }
  0x2f   : > { %p37_p10 = scmp.ge.s32.totalorder %s35_s30, 2  ;;  %s76_s4 = sadd.s32 1, %s1147_s14 }
  0x30   : > { %s186_s5 = sand.u32 1, %s1147_s14   ;;  %s812_s8 = sshll.u32 %s1155_s16, 6 }
  0x31   : > { %s1507_s30 = smov (%p37_p10, %s35_s30), 0  ;;  %s811_s6 = sshll.u32 %s186_s5, 7 }
  0x32   : > { %s72_s7 = ssub.s32 %s1155_s16, %s1507_s30  ;;  %s1307_s28 = scalar_lea.hbm %s1477_s1, %s812_s8 }
  0x33   : > { %p74_p3 = scmp.eq.s32.totalorder %s72_s7, 0  ;;  %s190_s27 = scalar_lea.vmem [#allocation6], %s811_s6 }
  0x34   : > { %s199_s11 = sshll.u32 %s190_s27, 4  ;;  %s1314_s19 = scalar_lea.sflag [#allocation7], %s186_s5  ;;  %s1312_s11 = int_to_ptr.vmem [resolvable:$true] %s199_s11 }
  0x35   : > { %s1310_s18 = scalar_select %p74_p3, %s1147_s14, %s76_s4  }
  0x36   : > { %s1043_s21 = scalar_lea.hbm %s1307_s28, 2048  ;;  %p1494_p8 = scmp.ne.s32.totalorder %s1493_s29, 0 }
  0x37   : > { %p1044_p6 = scmp.ne.s32.totalorder %s1307_s28, %s1043_s21  ;;  %s1048_s8 = scalar_lea.hbm %s1477_s1, 4096 }
  0x38   : > { %p1045_p12 = pneg %p1494_p8  ;;  %p1049_p2 = scmp.lt.u32.totalorder %s1307_s28, %s1477_s1 }
  0x39   : > { %p1050_p7 = scmp.lt.u32.totalorder %s1048_s8, %s1043_s21  ;;  %p1052_p11 = scmp.lt.u32.totalorder %s1043_s21, %s1307_s28 }
  0x3a   : > { %p1046_p0 = pnand %p1045_p12, %p1044_p6 }
  0x3b   : > { %p1051_p9 = por %p1050_p7, %p1049_p2 }
  0x3c   : > { %p1047_p5 = pneg %p1046_p0 }
  0x3d   : > { %p1053_p13 = por %p1052_p11, %p1051_p9 }
  0x3f   : > { %p1054_p4 = pnand %p1053_p13, %p1047_p5 }
  0x41   : > { %1057 = shalt.err (!%p1054_p4)
}
  0x42   : > { %s1058_s4 = scalar_lea.vmem %s1312_s11, 2048  ;;  %s1164_s5 = smov [#allocation6]  }
  0x43   : > { %p1059_p1 = scmp.ne.s32.totalorder %s1312_s11, %s1058_s4  ;;  %s1063_s10 = sshll.u32 %s1164_s5, 4  ;;  %s1064_s10 = int_to_ptr.vmem [resolvable:$false] %s1063_s10 }
  0x44   : > { %s1065_s27 = scalar_lea.vmem %s1064_s10, 4096  ;;  %p1066_p6 = scmp.lt.s32.totalorder %s1312_s11, %s1064_s10 }
  0x45   : > { %p1061_p10 = pnand %p1059_p1, %p1045_p12  ;;  %p1067_p0 = scmp.lt.s32.totalorder %s1065_s27, %s1058_s4 }
  0x47   : > { %p1062_p3 = pneg %p1061_p10  ;;  %p1068_p2 = por %p1067_p0, %p1066_p6 }
  0x49   : > { %p1069_p7 = pnand %p1068_p2, %p1062_p3 }
  0x4b   : > { %1072 = shalt.err (!%p1069_p7)
}
  0x4c   : > { %s1165_s21 = smov 128   ;;  %s1166_s26 = smov 64  }
  0x4d   : > { %s1167_s7 = smov 4   ;;  %p1495_p12 = scmp.ne.s32.totalorder %s1491_s25, 0 }
  0x4e   : > { %933 = dma.hbm_to_vmem [thread:$0]  (!%p1494_p8), %s1307_s28, 2048, %s1312_s11, %s1314_s19, %s1165_s21, %s1166_s26, %s1167_s7  }
  0x4f   : > { %217 = sbr.rel (%p1495_p12) target bundleno = 385 (0x181), region = 32  ;;  %p1496_p5 = scmp.ne.s32.totalorder (!%p1495_p12), %s1486_s20, 0 }
  0x56   : > { %1126 = dma.done.wait (%p1496_p5), [#allocation4], 4096  }
  0x57   : > { %1128 = vsyncadd (%p1496_p5), [#allocation4], 4294963200  ;;  %s1349_s8 = sand.u32 1, %s1143_s13   ;;  %p1497_p8 = scmp.ne.s32.totalorder %s1488_s22, 0 }
  0x58   : > { %s815_s6 = sshll.u32 %s1349_s8, 7  ;;  %s224_s9 = scalar_lea.sflag [#allocation7], %s1349_s8 }
  0x59   : > { %s1355_s29 = scalar_lea.vmem [#allocation6], %s815_s6 }
  0x5a   : > { %1130 = dma.done.wait (%p1497_p8), %s224_s9, 2048  }
  0x5b   : > { %1132 = vsyncadd (%p1497_p8), %s224_s9, 4294965248  ;;  %v999_v0 = vld [vmem:[%s1355_s29 + $0x40] sm:$0xff]   ;;  %v1001_v2 = vld [vmem:[%s1355_s29 + $0x48] sm:$0xff]   ;;  %p256_p9 = scmp.lt.s32.totalorder %s1151_s15, 1  ;;  %s1390_s11 = scalar_lea.vmem [#allocation8], %s815_s6 }
  0x5c   : > { %v1000_v1 = vld [vmem:[%s1355_s29] sm:$0xff]   ;;  %838 = vmatprep.subr.bf16.mxu0 %v999_v0  ;;  %902 = vmatprep.subr.bf16.mxu1 %v999_v0  ;;  %v1002_v3 = vld [vmem:[%s1355_s29 + $0x8] sm:$0xff]   ;;  %v1003_v4 = vld [vmem:[%s1355_s29 + $0x50] sm:$0xff]   ;;  %s835_s19 = sshll.u32 %s1151_s15, 7  ;;  %s692_s4 = sshll.u32 %s1390_s11, 4  ;;  %s1423_s4 = int_to_ptr.vmem [resolvable:$true] %s692_s4 }
  0x5d   : > { %839 = vmatpush3.bf16.msra.mxu0 %v1000_v1  ;;  %910 = vmatpush3.bf16.msra.mxu1 %v1000_v1  ;;  %v1004_v5 = vld [vmem:[%s1355_s29 + $0x10] sm:$0xff]   ;;  %v1005_v6 = vld [vmem:[%s1355_s29 + $0x58] sm:$0xff]   ;;  %v1007_v8 = vld [vmem:[%s1355_s29 + $0x60] sm:$0xff]   ;;  %s257_s20 = scalar_select %p256_p9, %s1151_s15, 1 }
  0x5e   : > { %840 = vmatprep.subr.bf16.mxu0 %v1001_v2  ;;  %903 = vmatprep.subr.bf16.mxu1 %v1001_v2  ;;  %v1006_v7 = vld [vmem:[%s1355_s29 + $0x18] sm:$0xff]   ;;  %v1008_v9 = vld [vmem:[%s1355_s29 + $0x20] sm:$0xff]   ;;  %v1009_v10 = vld [vmem:[%s1355_s29 + $0x68] sm:$0xff]   ;;  %s1421_s15 = scalar_lea.hbm %s1479_s3, %s835_s19  ;;  %s677_s27 = scalar_lea.sflag [#allocation5], %s1349_s8 }
  0x5f   : > { %v298_v11 = vld [vmem:[#allocation3 + $0x8] sm:$0xff]  ;;  %v300_v12 = vld [vmem:[#allocation3 + $0x18] sm:$0xff]  ;;  %v1011_v18 = vld [vmem:[%s1355_s29 + $0x70] sm:$0xff]   ;;  %s258_s28 = scalar_lea.vmem %s1478_s2, %s257_s20  ;;  %s1073_s21 = scalar_lea.vmem %s1423_s4, 2048 }
  0x60   : > { %v314_v13 = vld [vmem:[#allocation3 + $0x88] sm:$0xff]  ;;  %v330_v14 = vpack.c.bf16 %v300_v12, %v298_v11  ;;  %v316_v15 = vld [vmem:[#allocation3 + $0x98] sm:$0xff]  ;;  %v1012_v19 = vld [vmem:[%s1355_s29 + $0x30] sm:$0xff]   ;;  %p1074_p11 = scmp.ne.s32.totalorder %s1423_s4, %s1073_s21  ;;  %p1498_p13 = scmp.ne.s32.totalorder %s1489_s23, 0 }
  0x61   : > { %841 = vmatpush3.bf16.msra.mxu0 %v1002_v3  ;;  %911 = vmatpush3.bf16.msra.mxu1 %v1002_v3  ;;  %v338_v16 = vpack.c.bf16 %v316_v15, %v314_v13  ;;  %v1010_v17 = vld [vmem:[%s1355_s29 + $0x28] sm:$0xff]   ;;  %v1013_v20 = vld [vmem:[%s1355_s29 + $0x78] sm:$0xff]   ;;  %v297_v22 = vld [vmem:[#allocation3] sm:$0xff]  ;;  %s1168_s26 = smov [#allocation8]  }
  0x62   : > { %842 = vmatprep.subr.bf16.mxu0 %v1003_v4  ;;  %904 = vmatprep.subr.bf16.mxu1 %v1003_v4  ;;  %v1014_v21 = vld [vmem:[%s1355_s29 + $0x38] sm:$0xff]   ;;  %v299_v23 = vld [vmem:[#allocation3 + $0x10] sm:$0xff]  ;;  %v313_v24 = vld [vmem:[#allocation3 + $0x80] sm:$0xff]  ;;  %p1075_p4 = pnand %p1074_p11, %p1498_p13  ;;  %s1077_s7 = sshll.u32 %s1168_s26, 4  ;;  %s1078_s7 = int_to_ptr.vmem [resolvable:$false] %s1077_s7 }
  0x63   : > { %505 = vmatprep.mubr.bf16.mxu0 %v330_v14  ;;  %537 = vmatprep.mubr.bf16.mxu1 %v338_v16  ;;  %v315_v25 = vld [vmem:[#allocation3 + $0x90] sm:$0xff]  ;;  %v302_v26 = vld [vmem:[#allocation3 + $0x28] sm:$0xff]  ;;  %v304_v27 = vld [vmem:[#allocation3 + $0x38] sm:$0xff]  ;;  %v329_v30 = vpack.c.bf16 %v299_v23, %v297_v22  ;;  %s1079_s6 = scalar_lea.vmem %s1078_s7, 4096  ;;  %p1080_p10 = scmp.lt.s32.totalorder %s1423_s4, %s1078_s7 }
  0x64   : > { %v318_v28 = vld [vmem:[#allocation3 + $0xa8] sm:$0xff]  ;;  %v320_v29 = vld [vmem:[#allocation3 + $0xb8] sm:$0xff]  ;;  %v337_v31 = vpack.c.bf16 %v315_v25, %v313_v24  ;;  %v332_v32 = vpack.c.bf16 %v304_v27, %v302_v26  ;;  %v301_v34 = vld [vmem:[#allocation3 + $0x20] sm:$0xff]  ;;  %p1076_p1 = pneg %p1075_p4  ;;  %p1081_p3 = scmp.lt.s32.totalorder %s1079_s6, %s1073_s21 }
  0x65   : > { %843 = vmatpush3.bf16.msra.mxu0 %v1004_v5  ;;  %912 = vmatpush3.bf16.msra.mxu1 %v1004_v5  ;;  %v340_v33 = vpack.c.bf16 %v320_v29, %v318_v28  ;;  %v303_v35 = vld [vmem:[#allocation3 + $0x30] sm:$0xff]  ;;  %v317_v36 = vld [vmem:[#allocation3 + $0xa0] sm:$0xff]  ;;  %v306_v38 = vld [vmem:[#allocation3 + $0x48] sm:$0xff] }
  0x66   : > { %844 = vmatprep.subr.bf16.mxu0 %v1005_v6  ;;  %905 = vmatprep.subr.bf16.mxu1 %v1005_v6  ;;  %v319_v37 = vld [vmem:[#allocation3 + $0xb0] sm:$0xff]  ;;  %v308_v39 = vld [vmem:[#allocation3 + $0x58] sm:$0xff]  ;;  %v322_v40 = vld [vmem:[#allocation3 + $0xc8] sm:$0xff]  ;;  %v331_v42 = vpack.c.bf16 %v303_v35, %v301_v34  ;;  %p1082_p6 = por %p1081_p3, %p1080_p10 }
  0x67   : > { %v324_v41 = vld [vmem:[#allocation3 + $0xd8] sm:$0xff]  ;;  %v339_v43 = vpack.c.bf16 %v319_v37, %v317_v36  ;;  %v334_v44 = vpack.c.bf16 %v308_v39, %v306_v38  ;;  %v305_v46 = vld [vmem:[#allocation3 + $0x40] sm:$0xff]  ;;  %v307_v47 = vld [vmem:[#allocation3 + $0x50] sm:$0xff] }
  0x68   : > { %v342_v45 = vpack.c.bf16 %v324_v41, %v322_v40  ;;  %v321_v48 = vld [vmem:[#allocation3 + $0xc0] sm:$0xff]  ;;  %v323_v49 = vld [vmem:[#allocation3 + $0xd0] sm:$0xff]  ;;  %v310_v50 = vld [vmem:[#allocation3 + $0x68] sm:$0xff]  ;;  %v333_v54 = vpack.c.bf16 %v307_v47, %v305_v46  ;;  %p1083_p0 = pnand %p1082_p6, %p1076_p1 }
  0x69   : > { %845 = vmatpush3.bf16.msra.mxu0 %v1006_v7  ;;  %913 = vmatpush3.bf16.msra.mxu1 %v1006_v7  ;;  %v312_v51 = vld [vmem:[#allocation3 + $0x78] sm:$0xff]  ;;  %v326_v52 = vld [vmem:[#allocation3 + $0xe8] sm:$0xff]  ;;  %v341_v55 = vpack.c.bf16 %v323_v49, %v321_v48  ;;  %v309_v58 = vld [vmem:[#allocation3 + $0x60] sm:$0xff] }
  0x6a   : > { %846 = vmatprep.subr.bf16.mxu0 %v1007_v8  ;;  %906 = vmatprep.subr.bf16.mxu1 %v1007_v8  ;;  %v328_v53 = vld [vmem:[#allocation3 + $0xf8] sm:$0xff]  ;;  %v336_v56 = vpack.c.bf16 %v312_v51, %v310_v50  ;;  %v311_v59 = vld [vmem:[#allocation3 + $0x70] sm:$0xff]  ;;  %v325_v60 = vld [vmem:[#allocation3 + $0xe0] sm:$0xff] }
  0x6b   : > { %v344_v57 = vpack.c.bf16 %v328_v53, %v326_v52  ;;  %v327_v61 = vld [vmem:[#allocation3 + $0xf0] sm:$0xff]  ;;  %v335_v62 = vpack.c.bf16 %v311_v59, %v309_v58  ;;  %v1382_v3 = vld [vmem:[%s258_s28] ss:$0 sm:$0xff] }
  0x6c   : > { %v343_v63 = vpack.c.bf16 %v327_v61, %v325_v60 }
  0x6d   : > { %847 = vmatpush3.bf16.msra.mxu0 %v1008_v9  ;;  %914 = vmatpush3.bf16.msra.mxu1 %v1008_v9 }
  0x6e   : > { %848 = vmatprep.subr.bf16.mxu0 %v1009_v10  ;;  %907 = vmatprep.subr.bf16.mxu1 %v1009_v10 }
  0x71   : > { %849 = vmatpush3.bf16.msra.mxu0 %v1010_v17  ;;  %915 = vmatpush3.bf16.msra.mxu1 %v1010_v17 }
  0x72   : > { %850 = vmatprep.subr.bf16.mxu0 %v1011_v18  ;;  %908 = vmatprep.subr.bf16.mxu1 %v1011_v18 }
  0x75   : > { %851 = vmatpush3.bf16.msra.mxu0 %v1012_v19  ;;  %916 = vmatpush3.bf16.msra.mxu1 %v1012_v19 }
  0x76   : > { %852 = vmatprep.subr.bf16.mxu0 %v1013_v20  ;;  %909 = vmatprep.subr.bf16.mxu1 %v1013_v20 }
  0x79   : > { %853 = vmatpush3.bf16.msra.mxu0 %v1014_v21  ;;  %917 = vmatpush3.bf16.msra.mxu1 %v1014_v21 }
  0x7c   : > { %506 = vmatmul.mubr.bf16.vlgmr.msra.gmra.mrb[0].mxu0 %v329_v30  ;;  %538 = vmatmul.mubr.bf16.vlgmr.msra.gmra.mrb[0].mxu1 %v337_v31 }
  0x7d   : > { %513 = vmatprep.mubr.bf16.mxu0 %v332_v32  ;;  %545 = vmatprep.mubr.bf16.mxu1 %v340_v33 }
  0x84   : > { %514 = vmatmul.mubr.bf16.gmra.mrb[4].mxu0 %v331_v42  ;;  %546 = vmatmul.mubr.bf16.gmra.mrb[4].mxu1 %v339_v43 }
  0x85   : > { %521 = vmatprep.mubr.bf16.mxu0 %v334_v44  ;;  %553 = vmatprep.mubr.bf16.mxu1 %v342_v45 }
  0x8c   : > { %522 = vmatmul.mubr.bf16.gmra.mrb[8].mxu0 %v333_v54  ;;  %554 = vmatmul.mubr.bf16.gmra.mrb[8].mxu1 %v341_v55 }
  0x8d   : > { %529 = vmatprep.mubr.bf16.mxu0 %v336_v56  ;;  %561 = vmatprep.mubr.bf16.mxu1 %v344_v57 }
  0x94   : > { %530 = vmatmul.mubr.bf16.gmra.mrb[12].mxu0 %v335_v62  ;;  %562 = vmatmul.mubr.bf16.gmra.mrb[12].mxu1 %v343_v63 }
 0x14f   : > { %v854_v0 = vpop.f32.mrb[0].mxu0  ;;  %v878_v1 = vpop.f32.mrb[0].mxu1 }
 0x150   : > { %v855_v2 = vpop.f32.mrb[1].mxu0  ;;  %v879_v4 = vpop.f32.mrb[1].mxu1 }
 0x151   : > { %v856_v5 = vadd.f32 %v855_v2, %v854_v0  ;;  %v880_v6 = vadd.f32 %v879_v4, %v878_v1  ;;  %v857_v7 = vpop.f32.mrb[2].mxu0  ;;  %v881_v8 = vpop.f32.mrb[2].mxu1 }
 0x152   : > { %v858_v9 = vpop.f32.mrb[3].mxu0  ;;  %v882_v10 = vpop.f32.mrb[3].mxu1 }
 0x153   : > { %v628_v11 = vadd.f32 %v856_v5, %v1382_v3  ;;  %v636_v12 = vadd.f32 %v880_v6, %v1382_v3  ;;  %v859_v13 = vadd.f32 %v858_v9, %v857_v7  ;;  %v883_v14 = vadd.f32 %v882_v10, %v881_v8 }
 0x155   : > { %v644_v15 = vmax.f32 %v628_v11, 0.0  ;;  %v652_v16 = vmax.f32 %v636_v12, 0.0  ;;  %v629_v17 = vadd.f32 %v859_v13, %v1382_v3  ;;  %v637_v18 = vadd.f32 %v883_v14, %v1382_v3 }
 0x157   : > { %660 = vst [vmem:[%s1390_s11] sm:$0xff] %v644_v15  ;;  %668 = vst [vmem:[%s1390_s11 + $0x40] sm:$0xff] %v652_v16  ;;  %v645_v19 = vmax.f32 %v629_v17, 0.0  ;;  %v653_v20 = vmax.f32 %v637_v18, 0.0  ;;  %v860_v21 = vpop.f32.mrb[4].mxu0  ;;  %v884_v22 = vpop.f32.mrb[4].mxu1 }
 0x158   : > { %v861_v23 = vpop.f32.mrb[5].mxu0  ;;  %v885_v24 = vpop.f32.mrb[5].mxu1 }
 0x159   : > { %661 = vst [vmem:[%s1390_s11 + $0x8] sm:$0xff] %v645_v19  ;;  %669 = vst [vmem:[%s1390_s11 + $0x48] sm:$0xff] %v653_v20  ;;  %v862_v25 = vadd.f32 %v861_v23, %v860_v21  ;;  %v886_v26 = vadd.f32 %v885_v24, %v884_v22  ;;  %v863_v27 = vpop.f32.mrb[6].mxu0  ;;  %v887_v28 = vpop.f32.mrb[6].mxu1 }
 0x15a   : > { %v864_v29 = vpop.f32.mrb[7].mxu0  ;;  %v888_v30 = vpop.f32.mrb[7].mxu1 }
 0x15b   : > { %v630_v31 = vadd.f32 %v862_v25, %v1382_v3  ;;  %v638_v32 = vadd.f32 %v886_v26, %v1382_v3  ;;  %v865_v33 = vadd.f32 %v864_v29, %v863_v27  ;;  %v889_v34 = vadd.f32 %v888_v30, %v887_v28 }
 0x15d   : > { %v646_v35 = vmax.f32 %v630_v31, 0.0  ;;  %v654_v36 = vmax.f32 %v638_v32, 0.0  ;;  %v631_v37 = vadd.f32 %v865_v33, %v1382_v3  ;;  %v639_v38 = vadd.f32 %v889_v34, %v1382_v3 }
 0x15f   : > { %662 = vst [vmem:[%s1390_s11 + $0x10] sm:$0xff] %v646_v35  ;;  %670 = vst [vmem:[%s1390_s11 + $0x50] sm:$0xff] %v654_v36  ;;  %v647_v39 = vmax.f32 %v631_v37, 0.0  ;;  %v655_v40 = vmax.f32 %v639_v38, 0.0  ;;  %v866_v41 = vpop.f32.mrb[8].mxu0  ;;  %v890_v42 = vpop.f32.mrb[8].mxu1 }
 0x160   : > { %v867_v43 = vpop.f32.mrb[9].mxu0  ;;  %v891_v44 = vpop.f32.mrb[9].mxu1 }
 0x161   : > { %663 = vst [vmem:[%s1390_s11 + $0x18] sm:$0xff] %v647_v39  ;;  %671 = vst [vmem:[%s1390_s11 + $0x58] sm:$0xff] %v655_v40  ;;  %v868_v45 = vadd.f32 %v867_v43, %v866_v41  ;;  %v892_v46 = vadd.f32 %v891_v44, %v890_v42  ;;  %v869_v47 = vpop.f32.mrb[10].mxu0  ;;  %v893_v48 = vpop.f32.mrb[10].mxu1 }
 0x162   : > { %v870_v49 = vpop.f32.mrb[11].mxu0  ;;  %v894_v50 = vpop.f32.mrb[11].mxu1 }
 0x163   : > { %v632_v51 = vadd.f32 %v868_v45, %v1382_v3  ;;  %v640_v52 = vadd.f32 %v892_v46, %v1382_v3  ;;  %v871_v53 = vadd.f32 %v870_v49, %v869_v47  ;;  %v895_v54 = vadd.f32 %v894_v50, %v893_v48 }
 0x165   : > { %v648_v55 = vmax.f32 %v632_v51, 0.0  ;;  %v656_v56 = vmax.f32 %v640_v52, 0.0  ;;  %v633_v57 = vadd.f32 %v871_v53, %v1382_v3  ;;  %v641_v58 = vadd.f32 %v895_v54, %v1382_v3 }
 0x167   : > { %664 = vst [vmem:[%s1390_s11 + $0x20] sm:$0xff] %v648_v55  ;;  %672 = vst [vmem:[%s1390_s11 + $0x60] sm:$0xff] %v656_v56  ;;  %v649_v59 = vmax.f32 %v633_v57, 0.0  ;;  %v657_v60 = vmax.f32 %v641_v58, 0.0  ;;  %v872_v61 = vpop.f32.mrb[12].mxu0  ;;  %v896_v62 = vpop.f32.mrb[12].mxu1 }
 0x168   : > { %v873_v63 = vpop.f32.mrb[13].mxu0  ;;  %v897_v0 = vpop.f32.mrb[13].mxu1 }
 0x169   : > { %665 = vst [vmem:[%s1390_s11 + $0x28] sm:$0xff] %v649_v59  ;;  %673 = vst [vmem:[%s1390_s11 + $0x68] sm:$0xff] %v657_v60  ;;  %v874_v1 = vadd.f32 %v873_v63, %v872_v61  ;;  %v898_v2 = vadd.f32 %v897_v0, %v896_v62  ;;  %v875_v4 = vpop.f32.mrb[14].mxu0  ;;  %v899_v5 = vpop.f32.mrb[14].mxu1 }
 0x16a   : > { %v876_v6 = vpop.f32.mrb[15].mxu0  ;;  %v900_v7 = vpop.f32.mrb[15].mxu1 }
 0x16b   : > { %v634_v8 = vadd.f32 %v874_v1, %v1382_v3  ;;  %v642_v9 = vadd.f32 %v898_v2, %v1382_v3  ;;  %v877_v10 = vadd.f32 %v876_v6, %v875_v4  ;;  %v901_v11 = vadd.f32 %v900_v7, %v899_v5 }
 0x16d   : > { %v650_v12 = vmax.f32 %v634_v8, 0.0  ;;  %v658_v13 = vmax.f32 %v642_v9, 0.0  ;;  %v635_v14 = vadd.f32 %v877_v10, %v1382_v3  ;;  %v643_v15 = vadd.f32 %v901_v11, %v1382_v3 }
 0x16f   : > { %666 = vst [vmem:[%s1390_s11 + $0x30] sm:$0xff] %v650_v12  ;;  %674 = vst [vmem:[%s1390_s11 + $0x70] sm:$0xff] %v658_v13  ;;  %v651_v16 = vmax.f32 %v635_v14, 0.0  ;;  %v659_v17 = vmax.f32 %v643_v15, 0.0 }
 0x171   : > { %667 = vst [vmem:[%s1390_s11 + $0x38] sm:$0xff] %v651_v16  ;;  %675 = vst [vmem:[%s1390_s11 + $0x78] sm:$0xff] %v659_v17 }
 0x172   : > { %1086 = shalt.err (!%p1083_p0)
}
 0x173   : > { %s1087_s9 = scalar_lea.hbm %s1421_s15, 2048  ;;  %s1091_s22 = scalar_lea.hbm %s1479_s3, 4096 }
 0x174   : > { %p1088_p2 = scmp.ne.s32.totalorder %s1421_s15, %s1087_s9  ;;  %p1092_p5 = scmp.lt.u32.totalorder %s1421_s15, %s1479_s3 }
 0x175   : > { %p1093_p8 = scmp.lt.u32.totalorder %s1091_s22, %s1087_s9  ;;  %p1095_p11 = scmp.lt.u32.totalorder %s1087_s9, %s1421_s15 }
 0x176   : > { %p1089_p7 = pnand %p1088_p2, %p1498_p13 }
 0x177   : > { %p1094_p9 = por %p1093_p8, %p1092_p5 }
 0x178   : > { %p1090_p12 = pneg %p1089_p7 }
 0x179   : > { %p1096_p4 = por %p1095_p11, %p1094_p9 }
 0x17b   : > { %p1097_p1 = pnand %p1096_p4, %p1090_p12 }
 0x17d   : > { %1100 = shalt.err (!%p1097_p1)
}
 0x17e   : > { %s1169_s11 = smov 128   ;;  %s1170_s19 = smov 256  }
 0x17f   : > { %s1171_s5 = smov 8  }
 0x180   : > { %924 = dma.vmem_to_hbm [thread:$0]  (%p1498_p13), %s1423_s4, 2048, %s1421_s15, %s677_s27, %s1169_s11, %s1170_s19, %s1171_s5  }
 0x181 PF: > { %s707_s10 = sand.u32 1, %s1139_s12   ;;  %p1499_p10 = scmp.ne.s32.totalorder %s1490_s24, 0 }
 0x182   : > { %p1500_p3 = scmp.ge.s32.totalorder %s1159_s17, 2  ;;  %s708_s21 = scalar_lea.sflag [#allocation5], %s707_s10 }
 0x184   : > { %p935_p6 = pnand %p1500_p3, %p1499_p10 }
 0x186   : > { %1134 = dma.done.wait (!%p935_p6), %s708_s21, 2048  }
 0x187   : > { %1136 = vsyncadd (!%p935_p6), %s708_s21, 4294965248  ;;  %s20_s17 = sadd.s32 1, %s1159_s17   ;;  %s1501_s12 = smov %s1143_s13 }
 0x188   : > { %p17_p0 = scmp.ge.s32.totalorder %s20_s17, 4   ;;  %s1502_s13 = smov %s1147_s14 }
 0x189   : > { %s1503_s14 = smov %s1310_s18  ;;  %s1504_s15 = smov %s1155_s16 }
 0x18a   : > { %s1505_s16 = smov %s1507_s30  ;;  %19 = sbr.rel (!%p17_p0) target bundleno = 7 (0x7), region = 94 }
 0x191   :  { %713 = vsyncpa [#allocation4], 1 }
 0x192   :  { %715 = vsyncpa [#allocation4 + $0x1], 1 }
 0x193   :  { %716 = vsyncpa [#allocation7], 1 }
 0x194   :  { %718 = vsyncpa [#allocation7 + $0x1], 1 }
 0x195   :  { %719 = vsyncpa [#allocation5], 1 }
 0x196   :  { %721 = vsyncpa [#allocation5 + $0x1], 1 }

</bundles_post_ra>
